<compile_context>
chip_gen: v5e
topology: v5e:2x2
jax: 0.10.0
libtpu: 0.0.40
codegen_flags: <defaults>
</compile_context>

<pallas_src>
import functools

import jax
import jax.numpy as jnp
from jax.experimental import pallas as pl
from jax.experimental.pallas import tpu as pltpu


def _round_up(n, m):
    return ((n + m - 1) // m) * m


def _tpu_generation():
    """Best-effort chip generation + per-core VMEM capacity (bytes)."""
    kind = ""
    try:
        kind = jax.devices()[0].device_kind.lower()
    except Exception:
        pass
    is_v5e = ("v5e" in kind) or ("v5 lite" in kind) or ("v5lite" in kind)
    is_v7 = ("v7" in kind) or ("tpu7" in kind)
    vmem_cap = None
    try:
        vmem_cap = int(pltpu.get_tpu_info().vmem_capacity_bytes)
    except Exception:
        vmem_cap = None
    if vmem_cap is None or vmem_cap <= 0:
        vmem_cap = (64 << 20) if is_v7 else (128 << 20)
    return is_v5e, is_v7, vmem_cap


def _pos_enc_kernel(idx_ref, x_ref, pe_ref, o_ref, acc_ref, *,
                    n_genes, mask_g_tail, split_f32):
    # idx_ref: VMEM (tile_r, 1) int32      -- pe row index per output row
    # x_ref:   VMEM (tile_r, D)
    # pe_ref:  VMEM (g_chunk, D)           -- one gene chunk of the table
    # o_ref:   VMEM (tile_r, D)
    # acc_ref: VMEM (tile_r, D) f32 scratch (accumulates over gene chunks)
    j = pl.program_id(1)
    n_j = pl.num_programs(1)
    tile_r = x_ref.shape[0]
    g_chunk = pe_ref.shape[0]

    @pl.when(j == 0)
    def _():
        acc_ref[...] = jnp.zeros_like(acc_ref)

    # One-hot for this gene chunk: row r selects gene idx[r] iff it lies in
    # [j*g_chunk, (j+1)*g_chunk).  Out-of-range indices select nothing.
    idx = idx_ref[...]                                        # (tile_r, 1)
    local = idx - j * g_chunk
    iota = jax.lax.broadcasted_iota(jnp.int32, (tile_r, g_chunk), 1)
    onehot = (local == iota).astype(jnp.float32)              # (tile_r, g_chunk)

    pe_blk = pe_ref[...]
    if mask_g_tail:
        # The last gene chunk may read past the table: zero those rows so the
        # 0 * garbage products in the matmul cannot produce NaN/Inf.
        col = jax.lax.broadcasted_iota(jnp.int32, (g_chunk, 1), 0) + j * g_chunk
        pe_blk = jnp.where(col < n_genes, pe_blk, jnp.zeros_like(pe_blk))

    if split_f32:
        # Exact f32 gather in 3 single-pass bf16 matmuls (same MXU cost as
        # Precision.HIGH, but bitwise exact and only relies on DEFAULT-
        # precision lowering): pe == hi + mid + lo, each piece exact in bf16.
        onehot_b = onehot.astype(jnp.bfloat16)
        pe_f32 = pe_blk.astype(jnp.float32)
        hi = pe_f32.astype(jnp.bfloat16)
        rem = pe_f32 - hi.astype(jnp.float32)
        mid = rem.astype(jnp.bfloat16)
        lo = (rem - mid.astype(jnp.float32)).astype(jnp.bfloat16)
        part = (jnp.dot(onehot_b, hi, preferred_element_type=jnp.float32)
                + jnp.dot(onehot_b, mid, preferred_element_type=jnp.float32)
                + jnp.dot(onehot_b, lo, preferred_element_type=jnp.float32))
    else:
        # bf16/f16 tables: a single DEFAULT pass with f32 accumulate is exact.
        part = jnp.dot(onehot.astype(pe_blk.dtype), pe_blk,
                       preferred_element_type=jnp.float32)

    acc_ref[...] += part

    @pl.when(j == n_j - 1)
    def _():
        # One lane/sublane-dense (tile_r, D) store per row tile.
        o_ref[...] = (x_ref[...].astype(jnp.float32)
                      + acc_ref[...]).astype(o_ref.dtype)


def learnable_positional_encoding(x, tss_indexes, pe, *,
                                  tile_rows=None, onehot_g_max=None):
    """x: [B, S, D], tss_indexes: [B, S] int, pe: [G, D] -> [B, S, D]."""
    B, S, D = x.shape
    G, D_pe = pe.shape
    assert D == D_pe, (D, D_pe)
    R = B * S

    x2 = x.reshape(R, D)                                 # view, no copy
    idx = tss_indexes.reshape(R, 1).astype(jnp.int32)    # tiny

    x_item = jnp.dtype(x.dtype).itemsize
    pe_item = jnp.dtype(pe.dtype).itemsize
    # Sublane packing of the activation dtype (8 f32 / 16 bf16 / 32 int8) so
    # row tiles produce unmasked, fully packed stores.
    sub = {4: 8, 2: 16, 1: 32}.get(x_item, 8)

    is_v5e, is_v7, vmem_cap = _tpu_generation()

    # One-hot flops scale as 2*R*G*D while HBM bytes stay ~2*R*D*itemsize;
    # keep the per-chunk G small enough that the MXU hides under HBM time
    # (v5e's MXU is ~4.7x weaker -> smaller chunk).
    if onehot_g_max is None:
        onehot_g_max = 256 if is_v5e else 512
    g_chunk = G if G <= int(onehot_g_max) else int(onehot_g_max)

    # Row tile: as large as VMEM comfortably allows (amortizes the ~0.35us
    # per-grid-step overhead); v7x (3.2 TB/s HBM) benefits from 1024 rows at
    # small D.
    if tile_rows is None:
        tile_rows = 1024 if (is_v7 and D <= 256) else 512
    tile_r = min(_round_up(int(tile_rows), sub), _round_up(R, sub))
    if is_v7:
        # Two TensorCores per chip: keep >= 2 row tiles when possible so the
        # "parallel" axis actually feeds both cores.
        while pl.cdiv(R, tile_r) < 2 and tile_r > sub:
            tile_r = max(sub, _round_up(tile_r // 2, sub))

    def _est(tr, gc):
        return (2 * tr * D * x_item              # x tile, double-buffered
                + 2 * tr * D * x_item            # out tile, double-buffered
                + 2 * tr * 128 * 4               # idx tile (lane-padded to 128)
                + 2 * gc * D * pe_item           # pe chunk, double-buffered
                + tr * D * 4                     # f32 accumulator scratch
                + 3 * tr * gc * 4                # iota / one-hot temporaries
                + gc * D * (4 + 3 * 2)           # f32 residual + bf16 splits
                + tr * D * 4)                    # matmul partial

    budget = int(0.70 * vmem_cap)
    while _est(tile_r, g_chunk) > budget and tile_r > 4 * sub:
        tile_r = max(sub, _round_up(tile_r // 2, sub))
    while _est(tile_r, g_chunk) > budget and g_chunk > 128:
        g_chunk = max(128, _round_up(g_chunk // 2, 8))

    n_r = pl.cdiv(R, tile_r)
    n_g = pl.cdiv(G, g_chunk)
    mask_g_tail = (n_g > 1) and (G % g_chunk != 0)
    split_f32 = jnp.dtype(pe.dtype) == jnp.float32

    # Clamp to ~75% of the real per-core VMEM (v7x has only 64 MiB physical).
    vmem_limit = int(min(int(0.75 * vmem_cap),
                         max(3 * _est(tile_r, g_chunk) // 2 + (4 << 20),
                             32 << 20)))

    kernel = functools.partial(_pos_enc_kernel, n_genes=G,
                               mask_g_tail=mask_g_tail, split_f32=split_f32)

    out = pl.pallas_call(
        kernel,
        out_shape=jax.ShapeDtypeStruct((R, D), x.dtype),
        grid=(n_r, n_g),
        in_specs=[
            pl.BlockSpec((tile_r, 1), lambda i, j: (i, 0)),    # tss indexes
            pl.BlockSpec((tile_r, D), lambda i, j: (i, 0)),    # x row tile
            pl.BlockSpec((g_chunk, D), lambda i, j: (j, 0)),   # pe gene chunk
        ],
        out_specs=pl.BlockSpec((tile_r, D), lambda i, j: (i, 0)),
        scratch_shapes=[pltpu.VMEM((tile_r, D), jnp.float32)],
        compiler_params=pltpu.CompilerParams(
            dimension_semantics=("parallel", "arbitrary"),
            vmem_limit_bytes=vmem_limit,
        ),
    )(idx, x2, pe)

    return out.reshape(B, S, D)


if __name__ == "__main__":
    # Module config (synthetic, deterministic init)
    dim = 128
    n_genes = 32
    B, S = 2, 8

    key = jax.random.PRNGKey(0)
    k_pe, k_x, k_idx = jax.random.split(key, 3)

    pe = jax.random.normal(k_pe, (n_genes, dim), dtype=jnp.float32)  # nn.Parameter(randn)
    x = jax.random.normal(k_x, (B, S, dim), dtype=jnp.float32)
    tss_indexes = jax.random.randint(k_idx, (B, S), 0, n_genes, dtype=jnp.int32)

    # Pure-JAX reference (dropout in eval mode == identity)
    ref = x + pe[tss_indexes]

    # 1) Single gene-chunk path (table fits one one-hot matmul).
    out = learnable_positional_encoding(x, tss_indexes, pe)
    out = jax.block_until_ready(out)
    assert out.shape == ref.shape and out.dtype == ref.dtype
    assert jnp.allclose(out, ref, atol=1e-5, rtol=1e-5)

    # 2) Chunked-G path (forced small chunk -> 2 gene chunks + tail masking),
    #    exercising the reduction axis / accumulator scratch.
    out_chunked = learnable_positional_encoding(x, tss_indexes, pe,
                                                onehot_g_max=24)
    out_chunked = jax.block_until_ready(out_chunked)
    assert jnp.allclose(out_chunked, ref, atol=1e-5, rtol=1e-5)

    print("KERNEL_OK")
</pallas_src>

<mosaic_0001>
module attributes {stable_mosaic.version = 11 : i64} {
  func.func @_pos_enc_kernel(%arg0: i32, %arg1: i32, %arg2: memref<16x1xi32, #tpu.memory_space<vmem>>, %arg3: memref<16x128xf32, #tpu.memory_space<vmem>>, %arg4: memref<32x128xf32, #tpu.memory_space<vmem>>, %arg5: memref<16x128xf32, #tpu.memory_space<vmem>>, %arg6: memref<16x128xf32, #tpu.memory_space<vmem>>) attributes {dimension_semantics = [#tpu.dimension_semantics<parallel>, #tpu.dimension_semantics<arbitrary>], iteration_bounds = array<i64: 1, 1>, scalar_prefetch = 0 : i64, scratch_operands = 1 : i64, tpu.core_type = #tpu.core_type<tc>, window_params = [{transform_indices = @transform_0, window_bounds = array<i64: 16, 1>}, {transform_indices = @transform_1, window_bounds = array<i64: 16, 128>}, {transform_indices = @transform_2, window_bounds = array<i64: 32, 128>}, {transform_indices = @transform_3, window_bounds = array<i64: 16, 128>}]} {
    %c0_i32 = arith.constant 0 : i32
    %0 = arith.cmpi eq, %arg1, %c0_i32 : i32
    %1 = arith.extui %0 : i1 to i32
    %c0_i32_0 = arith.constant 0 : i32
    %2 = arith.cmpi ne, %1, %c0_i32_0 : i32
    scf.if %2 {
      %cst_12 = arith.constant 0.000000e+00 : f32
      %32 = vector.broadcast %cst_12 : f32 to vector<16x128xf32>
      %c0_13 = arith.constant 0 : index
      %c0_14 = arith.constant 0 : index
      %33 = vector.load %arg6[%c0_13, %c0_14] : memref<16x128xf32, #tpu.memory_space<vmem>>, vector<16x128xf32>
      tpu.vector_store %arg6[%c0_13, %c0_14], %32 {strides = array<i32>} : memref<16x128xf32, #tpu.memory_space<vmem>>, vector<16x128xf32>,
    } else {
    }
    %c0 = arith.constant 0 : index
    %c0_1 = arith.constant 0 : index
    %3 = vector.load %arg2[%c0, %c0_1] : memref<16x1xi32, #tpu.memory_space<vmem>>, vector<16x1xi32>
    %c32_i32 = arith.constant 32 : i32
    %4 = arith.muli %arg1, %c32_i32 : i32
    %5 = vector.broadcast %4 : i32 to vector<16x1xi32>
    %6 = arith.subi %3, %5 : vector<16x1xi32>
    %7 = tpu.iota {dimensions = array<i32: 1>} : vector<16x32xi32>
    %8 = vector.broadcast %6 : vector<16x1xi32> to vector<16x32xi32>
    %9 = arith.cmpi eq, %8, %7 : vector<16x32xi32>
    %10 = arith.extui %9 : vector<16x32xi1> to vector<16x32xi32>
    %11 = arith.sitofp %10 : vector<16x32xi32> to vector<16x32xf32>
    %c0_2 = arith.constant 0 : index
    %c0_3 = arith.constant 0 : index
    %12 = vector.load %arg4[%c0_2, %c0_3] : memref<32x128xf32, #tpu.memory_space<vmem>>, vector<32x128xf32>
    %13 = arith.truncf %11 : vector<16x32xf32> to vector<16x32xbf16>
    %14 = arith.truncf %12 : vector<32x128xf32> to vector<32x128xbf16>
    %15 = arith.extf %14 : vector<32x128xbf16> to vector<32x128xf32>
    %16 = arith.subf %12, %15 : vector<32x128xf32>
    %17 = arith.truncf %16 : vector<32x128xf32> to vector<32x128xbf16>
    %18 = arith.extf %17 : vector<32x128xbf16> to vector<32x128xf32>
    %19 = arith.subf %16, %18 : vector<32x128xf32>
    %20 = arith.truncf %19 : vector<32x128xf32> to vector<32x128xbf16>
    %cst = arith.constant dense<0.000000e+00> : vector<16x128xf32>
    %21 = tpu.matmul %13, %14, %cst {dimension_numbers = #tpu.dot_dimension_numbers<[1], [0], [0], [1], [0, 0, 1, 1], [], []>} : vector<16x32xbf16>, vector<32x128xbf16>, vector<16x128xf32> -> vector<16x128xf32>
    %cst_4 = arith.constant dense<0.000000e+00> : vector<16x128xf32>
    %22 = tpu.matmul %13, %17, %cst_4 {dimension_numbers = #tpu.dot_dimension_numbers<[1], [0], [0], [1], [0, 0, 1, 1], [], []>} : vector<16x32xbf16>, vector<32x128xbf16>, vector<16x128xf32> -> vector<16x128xf32>
    %23 = arith.addf %21, %22 : vector<16x128xf32>
    %cst_5 = arith.constant dense<0.000000e+00> : vector<16x128xf32>
    %24 = tpu.matmul %13, %20, %cst_5 {dimension_numbers = #tpu.dot_dimension_numbers<[1], [0], [0], [1], [0, 0, 1, 1], [], []>} : vector<16x32xbf16>, vector<32x128xbf16>, vector<16x128xf32> -> vector<16x128xf32>
    %25 = arith.addf %23, %24 : vector<16x128xf32>
    %c0_6 = arith.constant 0 : index
    %c0_7 = arith.constant 0 : index
    %26 = vector.load %arg6[%c0_6, %c0_7] : memref<16x128xf32, #tpu.memory_space<vmem>>, vector<16x128xf32>
    %27 = arith.addf %26, %25 : vector<16x128xf32>
    %c0_8 = arith.constant 0 : index
    %c0_9 = arith.constant 0 : index
    %28 = vector.load %arg6[%c0_8, %c0_9] : memref<16x128xf32, #tpu.memory_space<vmem>>, vector<16x128xf32>
    tpu.vector_store %arg6[%c0_8, %c0_9], %27 {strides = array<i32>} : memref<16x128xf32, #tpu.memory_space<vmem>>, vector<16x128xf32>,
    %c0_i32_10 = arith.constant 0 : i32
    %29 = arith.cmpi eq, %arg1, %c0_i32_10 : i32
    %30 = arith.extui %29 : i1 to i32
    %c0_i32_11 = arith.constant 0 : i32
    %31 = arith.cmpi ne, %30, %c0_i32_11 : i32
    scf.if %31 {
      %c0_12 = arith.constant 0 : index
      %c0_13 = arith.constant 0 : index
      %32 = vector.load %arg3[%c0_12, %c0_13] : memref<16x128xf32, #tpu.memory_space<vmem>>, vector<16x128xf32>
      %c0_14 = arith.constant 0 : index
      %c0_15 = arith.constant 0 : index
      %33 = vector.load %arg6[%c0_14, %c0_15] : memref<16x128xf32, #tpu.memory_space<vmem>>, vector<16x128xf32>
      %34 = arith.addf %32, %33 : vector<16x128xf32>
      %c0_16 = arith.constant 0 : index
      %c0_17 = arith.constant 0 : index
      %35 = vector.load %arg5[%c0_16, %c0_17] : memref<16x128xf32, #tpu.memory_space<vmem>>, vector<16x128xf32>
      tpu.vector_store %arg5[%c0_16, %c0_17], %34 {strides = array<i32>} : memref<16x128xf32, #tpu.memory_space<vmem>>, vector<16x128xf32>,
    } else {
    }
    return
  }
  func.func @transform_0(%arg0: i32, %arg1: i32) -> (i32, i32) {
    %c0_i32 = arith.constant 0 : i32
    %c0_i32_0 = arith.constant 0 : i32
    return %arg0, %c0_i32 : i32, i32
  }
  func.func @transform_1(%arg0: i32, %arg1: i32) -> (i32, i32) {
    %c0_i32 = arith.constant 0 : i32
    %c0_i32_0 = arith.constant 0 : i32
    return %arg0, %c0_i32 : i32, i32
  }
  func.func @transform_2(%arg0: i32, %arg1: i32) -> (i32, i32) {
    %c0_i32 = arith.constant 0 : i32
    %c0_i32_0 = arith.constant 0 : i32
    return %arg1, %c0_i32 : i32, i32
  }
  func.func @transform_3(%arg0: i32, %arg1: i32) -> (i32, i32) {
    %c0_i32 = arith.constant 0 : i32
    %c0_i32_0 = arith.constant 0 : i32
    return %arg0, %c0_i32 : i32, i32
  }
}

</mosaic_0001>

<bundles_post_ra>
// kernel: tpu_custom_call.1
= control target key start
LH: loop header
LB: loop body
LE: loop exit
PB: predicated region body
PF: predicated region fallthrough
CT: control target
= control target key end

     0   :  { %8 = vsyncpa [#allocation4], 0  ;;  %s311_s0 = inlined_call_operand.vmem [shape: s32[16,1], index: 0, kind: input, shape index: {}]   ;;  %s312_s1 = inlined_call_operand.vmem [shape: f32[16,128], index: 1, kind: input, shape index: {}]   ;;  %s313_s2 = inlined_call_operand.hbm [shape: f32[32,128], index: 2, kind: input, shape index: {}]   ;;  %s314_s3 = inlined_call_operand.hbm [shape: f32[16,128], index: 3, kind: output, shape index: {}]  }
   0x1   :  { %9 = vsyncpa [#allocation5], 0  ;;  %s18_s14 = sshll.u32 %s313_s2, 4  ;;  %s261_s15 = smov [#allocation3]   ;;  %s19_s14 = int_to_ptr.hbm [resolvable:$true] %s18_s14 }
   0x2   :  { %s20_s16 = sshll.u32 %s261_s15, 4  ;;  %s262_s17 = smov 128   ;;  %s21_s16 = int_to_ptr.vmem [resolvable:$true] %s20_s16 }
   0x3   :  { %s263_s18 = smov 8  }
   0x4   :  { %26 = dma.hbm_to_vmem [thread:$0]  %s19_s14, 512, %s21_s16, [#allocation4], %s262_s17, %s262_s17, %s263_s18  }
   0x5   :  { %257 = dma.done.wait [#allocation4], 512  }
   0x6   :  { %258 = vsyncadd [#allocation4], 4294966784  ;;  %v264_v0 = vmov 0   ;;  %v38_v1 = vld [vmem:[%s311_s0] sm:$0xff]  ;;  %v39_v2 = vld [vmem:[%s311_s0 + $0x8] sm:$0xff]  ;;  %v44_v45 = vlaneseq  ;;  %v265_v49 = vmov 0.0  }
   0x7   :  { %208 = vset.pattern.permute.xlu0 %v264_v0  ;;  %v56_v3 = vld [vmem:[#allocation3 + $0x10] sm:$0xff]  ;;  %v57_v4 = vld [vmem:[#allocation3 + $0x18] sm:$0xff]  ;;  %v54_v9 = vld [vmem:[#allocation3] sm:$0xff]  ;;  %vm101_vm2 = vcmask 261120   ;;  %s266_s25 = smov [#allocation6]   ;;  %s184_s29 = sshll.u32 %s314_s3, 4  ;;  %s185_s29 = int_to_ptr.hbm [resolvable:$true] %s184_s29 }
   0x8   :  { %47 = vperm.xlu0 %208, %v38_v1   ;;  %v65_v5 = vpack.c.bf16 %v56_v3, %v56_v3  ;;  %v66_v6 = vpack.c.bf16 %v57_v4, %v57_v4  ;;  %v55_v10 = vld [vmem:[#allocation3 + $0x8] sm:$0xff]  ;;  %v63_v13 = vpack.c.bf16 %v54_v9, %v54_v9  ;;  %v45_v47 = vand.u32 127, %v44_v45  ;;  %v170_v57 = vld [vmem:[%s312_s1] sm:$0xff]  ;;  %s182_s26 = sshll.u32 %s266_s25, 4  ;;  %s183_s26 = int_to_ptr.vmem [resolvable:$true] %s182_s26 }
   0x9   :  { %v64_v14 = vpack.c.bf16 %v55_v10, %v55_v10  ;;  %v171_v0 = vld [vmem:[%s312_s1 + $0x8] sm:$0xff] }
   0xa   :  { %v69_v7 = vunpack.c.l.bf16 %v65_v5  ;;  %v70_v8 = vunpack.c.l.bf16 %v66_v6  ;;  %v67_v17 = vunpack.c.l.bf16 %v63_v13  ;;  %v125_v25 = vunpack.c.l.b16 %v65_v5 }
   0xb   :  { %v68_v18 = vunpack.c.l.bf16 %v64_v14  ;;  %v126_v26 = vunpack.c.l.b16 %v66_v6  ;;  %v123_v38 = vunpack.c.l.b16 %v63_v13  ;;  %v124_v39 = vunpack.c.l.b16 %v64_v14 }
   0xc   :  { %v73_v11 = vsub.f32 %v56_v3, %v69_v7  ;;  %v74_v12 = vsub.f32 %v57_v4, %v70_v8  ;;  %v71_v21 = vsub.f32 %v54_v9, %v67_v17 }
   0xd   :  { %v72_v22 = vsub.f32 %v55_v10, %v68_v18  ;;  %v128_v32 = vpack.c.b16 %v126_v26, %v125_v25  ;;  %v127_v43 = vpack.c.b16 %v124_v39, %v123_v38 }
   0xe   :  { %v77_v15 = vpack.c.bf16 %v73_v11, %v73_v11  ;;  %v78_v16 = vpack.c.bf16 %v74_v12, %v74_v12  ;;  %v75_v29 = vpack.c.bf16 %v71_v21, %v71_v21 }
   0xf   :  { %v76_v30 = vpack.c.bf16 %v72_v22, %v72_v22  ;;  %137 = vmatpush.bf16.msra.mxu1 %v128_v32 }
  0x10   :  { %50 = vperm.xlu0 %208, %v39_v2   ;;  %v81_v19 = vunpack.c.l.bf16 %v77_v15  ;;  %v82_v20 = vunpack.c.l.bf16 %v78_v16  ;;  %v95_v23 = vunpack.c.l.b16 %v77_v15  ;;  %v96_v24 = vunpack.c.l.b16 %v78_v16 }
  0x11   :  { %v79_v34 = vunpack.c.l.bf16 %v75_v29  ;;  %v80_v35 = vunpack.c.l.bf16 %v76_v30  ;;  %v93_v36 = vunpack.c.l.b16 %v75_v29  ;;  %v94_v37 = vunpack.c.l.b16 %v76_v30 }
  0x12   :  { %v85_v27 = vsub.f32 %v73_v11, %v81_v19  ;;  %v86_v28 = vsub.f32 %v74_v12, %v82_v20  ;;  %v98_v31 = vpack.c.b16 %v96_v24, %v95_v23 }
  0x13   :  { %v83_v40 = vsub.f32 %v71_v21, %v79_v34  ;;  %v84_v41 = vsub.f32 %v72_v22, %v80_v35  ;;  %v97_v42 = vpack.c.b16 %v94_v37, %v93_v36  ;;  %138 = vmatpush.bf16.msra.mxu1 %v127_v43 }
  0x14   :  { %v88_v33 = vpack.c.bf16 %v86_v28, %v85_v27  ;;  %111 = vmatpush.bf16.msra.mxu0 %v98_v31 }
  0x15   :  { %v87_v44 = vpack.c.bf16 %v84_v41, %v83_v40 }
  0x16   :  { %151 = vmatpush.bf16.msra.mxu2 %v88_v33 }
  0x18   :  { %112 = vmatpush.bf16.msra.mxu0 %v97_v42 }
  0x1a   :  { %152 = vmatpush.bf16.msra.mxu2 %v87_v44 }
  0x7a   :  { %v48_v46 = vpop.permute.xlu0 %47 }
  0x7b   :  { %vm52_vm0 = vcmp.eq.s32.totalorder %v48_v46, %v45_v47 }
  0x7c   :  { %v197_v50 = vsel %vm52_vm0, 1.0, %v265_v49 }
  0x82   :  { %v51_v48 = vpop.permute.xlu0 %50 }
  0x83   :  { %vm53_vm1 = vcmp.eq.s32.totalorder %v51_v48, %v45_v47 }
  0x84   :  { %v198_v51 = vsel %vm53_vm1, 1.0, %v265_v49 }
  0x85   :  { %v62_v52 = vpack.c.bf16 %v198_v51, %v197_v50 }
  0x87   :  { %199 = vmatmul.msk.bf16.vlgmr.msra.gmra.mxu0 %vm101_vm2, %v62_v52  ;;  %200 = vmatmul.msk.bf16.vlgmr.msra.gmra.mxu1 %vm101_vm2, %v62_v52 }
  0x88   :  { %201 = vmatmul.msk.bf16.vlgmr.msra.gmra.mxu2 %vm101_vm2, %v62_v52 }
 0x104   :  { %v114_v53 = vpop.f32.mrf.mxu0  ;;  %v140_v54 = vpop.f32.mrf.mxu1 }
 0x105   :  { %v141_v55 = vadd.f32 %v140_v54, %v114_v53 }
 0x10b   :  { %v154_v56 = vpop.f32.mrf.mxu2 }
 0x10c   :  { %v159_v58 = vadd.f32 %v154_v56, %v141_v55  ;;  %v116_v60 = vpop.f32.mrf.mxu0  ;;  %v142_v61 = vpop.f32.mrf.mxu1 }
 0x10d   :  { %v143_v62 = vadd.f32 %v142_v61, %v116_v60 }
 0x10e   :  { %v174_v59 = vadd.f32 %v170_v57, %v159_v58 }
 0x110   :  { %176 = vst [vmem:[#allocation6] sm:$0xff] %v174_v59 }
 0x113   :  { %v156_v63 = vpop.f32.mrf.mxu2 }
 0x114   :  { %v160_v1 = vadd.f32 %v156_v63, %v143_v62 }
 0x116   :  { %v175_v2 = vadd.f32 %v171_v0, %v160_v1 }
 0x118   :  { %177 = vst [vmem:[#allocation6 + $0x8] sm:$0xff] %v175_v2 }
 0x119   :  { %190 = dma.vmem_to_hbm [thread:$0]  %s183_s26, 256, %s185_s29, [#allocation5], %s262_s17, %s262_s17, %s263_s18  }
 0x11a   :  { %259 = dma.done.wait [#allocation5], 256  }
 0x11b   :  { %260 = vsyncadd [#allocation5], 4294967040 }
 0x11c   :  { %195 = vsyncpa [#allocation4], 1 }
 0x11d   :  { %196 = vsyncpa [#allocation5], 1 }

</bundles_post_ra>
